<compile_context>
chip_gen: v6e
topology: v6e:2x2x1
jax: 0.10.0
libtpu: 0.0.40
codegen_flags: <defaults>
</compile_context>

<pallas_src>
import functools

import jax
import jax.numpy as jnp
from jax.experimental import pallas as pl
from jax.experimental.pallas import tpu as pltpu


def _prompt_kernel(labels_ref, prefix_ref, suffix_ref, ctx_ref, out_ref, *,
                   tb, n_prefix, n_ctx):
    """One grid step assembles TB full prompt rows.

    labels_ref: (B_pad,) int32 in SMEM      (scalar prefetch)
    prefix_ref: (1, n_prefix, D) VMEM       (shared, resident)
    suffix_ref: (1, n_suffix, D) VMEM       (shared, resident)
    ctx_ref:    (num_classes, n_ctx, D)     (full table, resident)
    out_ref:    (tb, L, D)
    """
    b0 = pl.program_id(0) * tb

    # Shared prefix / suffix: one broadcast + one wide store each for all TB rows.
    pre = prefix_ref[...]
    suf = suffix_ref[...]
    out_ref[:, :n_prefix, :] = jnp.broadcast_to(pre, (tb,) + pre.shape[1:])
    out_ref[:, n_prefix + n_ctx:, :] = jnp.broadcast_to(suf, (tb,) + suf.shape[1:])

    # Class-conditional context gather: labels come from SMEM, cls_ctx rows are
    # sliced out of the VMEM-resident table (no per-row HBM gather DMA).
    def copy_row(i):
        lab = labels_ref[b0 + i]
        out_ref[i, n_prefix:n_prefix + n_ctx, :] = ctx_ref[lab].astype(out_ref.dtype)

    if tb <= 8:
        # Short trip count: unroll at trace time.
        for i in range(tb):
            copy_row(i)
    else:
        @pl.loop(0, tb)
        def _(i):
            copy_row(i)


def prompt_learner_forward(labels, token_prefix, token_suffix, cls_ctx,
                           *, block_b=None):
    """labels: (B,) int; returns (B, L, D) prompt embeddings."""
    B = labels.shape[0]
    _, n_prefix, D = token_prefix.shape
    _, n_suffix, _ = token_suffix.shape
    num_classes, n_ctx, _ = cls_ctx.shape
    L = n_prefix + n_ctx + n_suffix
    dtype = token_prefix.dtype
    itemsize = jnp.dtype(dtype).itemsize

    # ---- choose TB (batch rows per grid step) against a VMEM budget -------
    # Double-buffered output block must stay well under the v7x scoped budget.
    out_budget = 24 * 1024 * 1024                   # bytes for 2 output buffers
    row_bytes = L * D * itemsize
    tb = block_b or max(1, min(B, out_budget // max(1, 2 * row_bytes), 256))

    n_blocks = pl.cdiv(B, tb)
    B_pad = n_blocks * tb

    labels_i32 = labels.astype(jnp.int32)
    if B_pad != B:
        labels_i32 = jnp.pad(labels_i32, (0, B_pad - B))  # pad with class 0

    # Explicit VMEM limit: 2x output block + resident tables, with headroom.
    # TODO(synk): for very large class counts (table >> VMEM) switch the ctx
    # gather to a per-row manual DMA from HBM instead of a resident table.
    const_bytes = (num_classes * n_ctx + n_prefix + n_suffix) * D * itemsize
    vmem_need = 2 * tb * row_bytes + 2 * const_bytes + (1 << 20)
    vmem_limit = int(min(max(vmem_need, 16 * 1024 * 1024), 64 * 1024 * 1024))

    kernel = functools.partial(_prompt_kernel, tb=tb, n_prefix=n_prefix,
                               n_ctx=n_ctx)

    grid_spec = pltpu.PrefetchScalarGridSpec(
        num_scalar_prefetch=1,                      # labels -> SMEM
        grid=(n_blocks,),
        in_specs=[
            # prefix / suffix: shared across the batch, resident (constant idx).
            pl.BlockSpec((1, n_prefix, D), lambda b, lab: (0, 0, 0)),
            pl.BlockSpec((1, n_suffix, D), lambda b, lab: (0, 0, 0)),
            # Full class-context table resident in VMEM.
            pl.BlockSpec((num_classes, n_ctx, D), lambda b, lab: (0, 0, 0)),
        ],
        out_specs=pl.BlockSpec((tb, L, D), lambda b, lab: (b, 0, 0)),
    )

    out = pl.pallas_call(
        kernel,
        out_shape=jax.ShapeDtypeStruct((B_pad, L, D), dtype),
        grid_spec=grid_spec,
        compiler_params=pltpu.CompilerParams(
            dimension_semantics=("parallel",),      # independent batch blocks
            vmem_limit_bytes=vmem_limit),
    )(labels_i32, token_prefix, token_suffix, cls_ctx)

    return out[:B] if B_pad != B else out


def _reference(labels, token_prefix, token_suffix, cls_ctx):
    B = labels.shape[0]
    return jnp.concatenate(
        [jnp.broadcast_to(token_prefix, (B,) + token_prefix.shape[1:]),
         cls_ctx[labels],
         jnp.broadcast_to(token_suffix, (B,) + token_suffix.shape[1:])],
        axis=1)


if __name__ == "__main__":
    # Small, forward-consistent shapes.
    n_ctx = 4          # number of class-specific context tokens ("X X X X")
    ctx_dim = 32       # token embedding dim D
    seq_len = 16       # tokenized template length L
    num_classes = 6
    B = 2

    key = jax.random.PRNGKey(0)
    k_embed, k_ctx, k_lab = jax.random.split(key, 3)

    # Deterministic synthetic template embedding (stand-in for
    # clip_model.token_embedding(clip.tokenize(template))).
    embed = jax.random.normal(k_embed, (1, seq_len, ctx_dim), dtype=jnp.float32)
    token_prefix = embed[:, : n_ctx + 1, :]                     # (1, 5, D)
    token_suffix = embed[:, n_ctx + 1 + n_ctx:, :]              # (1, 7, D)

    # cls_ctx ~ uniform(-0.02, 0.02), as in __init__.
    cls_ctx = jax.random.uniform(
        k_ctx, (num_classes, n_ctx, ctx_dim),
        minval=-0.02, maxval=0.02, dtype=jnp.float32)

    labels = jax.random.randint(k_lab, (B,), 0, num_classes, dtype=jnp.int32)

    # --- main check: B=2 (unrolled copy path, single grid step) ------------
    out = prompt_learner_forward(labels, token_prefix, token_suffix, cls_ctx)
    out = jax.block_until_ready(out)
    ref = _reference(labels, token_prefix, token_suffix, cls_ctx)
    assert out.shape == (B, seq_len, ctx_dim), out.shape
    assert jnp.allclose(out, ref), "mismatch vs reference (B=2)"

    # --- extra check: larger batch, pl.loop copy path (single grid step) ---
    B2 = 37
    labels2 = jax.random.randint(jax.random.PRNGKey(1), (B2,), 0, num_classes,
                                 dtype=jnp.int32)
    out2 = jax.block_until_ready(
        prompt_learner_forward(labels2, token_prefix, token_suffix, cls_ctx))
    assert jnp.allclose(out2, _reference(labels2, token_prefix, token_suffix,
                                         cls_ctx)), "mismatch (B=37)"

    # --- extra check: multi-block grid with padding (block_b=8) ------------
    out3 = jax.block_until_ready(
        prompt_learner_forward(labels2, token_prefix, token_suffix, cls_ctx,
                               block_b=8))
    assert out3.shape == (B2, seq_len, ctx_dim), out3.shape
    assert jnp.allclose(out3, _reference(labels2, token_prefix, token_suffix,
                                         cls_ctx)), "mismatch (B=37, tb=8)"

    print("KERNEL_OK")
</pallas_src>

<mosaic_0001>
module attributes {stable_mosaic.version = 11 : i64} {
  func.func @_prompt_kernel(%arg0: i32, %arg1: memref<2xi32, #tpu.memory_space<smem>>, %arg2: memref<1x5x32xf32, #tpu.memory_space<vmem>>, %arg3: memref<1x7x32xf32, #tpu.memory_space<vmem>>, %arg4: memref<6x4x32xf32, #tpu.memory_space<vmem>>, %arg5: memref<2x16x32xf32, #tpu.memory_space<vmem>>) attributes {dimension_semantics = [#tpu.dimension_semantics<parallel>], iteration_bounds = array<i64: 1>, scalar_prefetch = 1 : i64, scratch_operands = 0 : i64, tpu.core_type = #tpu.core_type<tc>, window_params = [{pipeline_mode = #tpu.pipeline_mode<synchronous>, transform_indices = @transform_0, window_bounds = array<i64: 1, 5, 32>}, {pipeline_mode = #tpu.pipeline_mode<synchronous>, transform_indices = @transform_1, window_bounds = array<i64: 1, 7, 32>}, {pipeline_mode = #tpu.pipeline_mode<synchronous>, transform_indices = @transform_2, window_bounds = array<i64: 6, 4, 32>}, {transform_indices = @transform_3, window_bounds = array<i64: 2, 16, 32>}]} {
    %c2_i32 = arith.constant 2 : i32
    %0 = arith.muli %arg0, %c2_i32 : i32
    %c0 = arith.constant 0 : index
    %c0_0 = arith.constant 0 : index
    %c0_1 = arith.constant 0 : index
    %1 = vector.load %arg2[%c0, %c0_0, %c0_1] : memref<1x5x32xf32, #tpu.memory_space<vmem>>, vector<1x5x32xf32>
    %c0_2 = arith.constant 0 : index
    %c0_3 = arith.constant 0 : index
    %c0_4 = arith.constant 0 : index
    %2 = vector.load %arg3[%c0_2, %c0_3, %c0_4] : memref<1x7x32xf32, #tpu.memory_space<vmem>>, vector<1x7x32xf32>
    %3 = vector.shape_cast %1 : vector<1x5x32xf32> to vector<1x5x32xf32>
    %4 = vector.broadcast %3 : vector<1x5x32xf32> to vector<2x5x32xf32>
    %c0_5 = arith.constant 0 : index
    %c0_6 = arith.constant 0 : index
    %c0_7 = arith.constant 0 : index
    %5 = vector.load %arg5[%c0_5, %c0_6, %c0_7] : memref<2x16x32xf32, #tpu.memory_space<vmem>>, vector<2x5x32xf32>
    tpu.vector_store %arg5[%c0_5, %c0_6, %c0_7], %4 {strides = array<i32>} : memref<2x16x32xf32, #tpu.memory_space<vmem>>, vector<2x5x32xf32>,
    %6 = vector.shape_cast %2 : vector<1x7x32xf32> to vector<1x7x32xf32>
    %7 = vector.broadcast %6 : vector<1x7x32xf32> to vector<2x7x32xf32>
    %c0_8 = arith.constant 0 : index
    %c9 = arith.constant 9 : index
    %c0_9 = arith.constant 0 : index
    %8 = vector.load %arg5[%c0_8, %c9, %c0_9] : memref<2x16x32xf32, #tpu.memory_space<vmem>>, vector<2x7x32xf32>
    tpu.vector_store %arg5[%c0_8, %c9, %c0_9], %7 {strides = array<i32>} : memref<2x16x32xf32, #tpu.memory_space<vmem>>, vector<2x7x32xf32>,
    %c0_i32 = arith.constant 0 : i32
    %9 = arith.addi %0, %c0_i32 : i32
    %10 = arith.index_cast %9 : i32 to index
    %11 = memref.load %arg1[%10] : memref<2xi32, #tpu.memory_space<smem>>
    %12 = arith.index_cast %11 : i32 to index
    %c0_10 = arith.constant 0 : index
    %c0_11 = arith.constant 0 : index
    %13 = vector.load %arg4[%12, %c0_10, %c0_11] : memref<6x4x32xf32, #tpu.memory_space<vmem>>, vector<1x4x32xf32>
    %14 = vector.shape_cast %13 : vector<1x4x32xf32> to vector<4x32xf32>
    %c0_12 = arith.constant 0 : index
    %c5 = arith.constant 5 : index
    %c0_13 = arith.constant 0 : index
    %15 = vector.load %arg5[%c0_12, %c5, %c0_13] : memref<2x16x32xf32, #tpu.memory_space<vmem>>, vector<1x4x32xf32>
    %16 = vector.shape_cast %15 : vector<1x4x32xf32> to vector<4x32xf32>
    %17 = vector.shape_cast %14 : vector<4x32xf32> to vector<1x4x32xf32>
    tpu.vector_store %arg5[%c0_12, %c5, %c0_13], %17 {strides = array<i32>} : memref<2x16x32xf32, #tpu.memory_space<vmem>>, vector<1x4x32xf32>,
    %c1_i32 = arith.constant 1 : i32
    %18 = arith.addi %0, %c1_i32 : i32
    %19 = arith.index_cast %18 : i32 to index
    %20 = memref.load %arg1[%19] : memref<2xi32, #tpu.memory_space<smem>>
    %21 = arith.index_cast %20 : i32 to index
    %c0_14 = arith.constant 0 : index
    %c0_15 = arith.constant 0 : index
    %22 = vector.load %arg4[%21, %c0_14, %c0_15] : memref<6x4x32xf32, #tpu.memory_space<vmem>>, vector<1x4x32xf32>
    %23 = vector.shape_cast %22 : vector<1x4x32xf32> to vector<4x32xf32>
    %c1 = arith.constant 1 : index
    %c5_16 = arith.constant 5 : index
    %c0_17 = arith.constant 0 : index
    %24 = vector.load %arg5[%c1, %c5_16, %c0_17] : memref<2x16x32xf32, #tpu.memory_space<vmem>>, vector<1x4x32xf32>
    %25 = vector.shape_cast %24 : vector<1x4x32xf32> to vector<4x32xf32>
    %26 = vector.shape_cast %23 : vector<4x32xf32> to vector<1x4x32xf32>
    tpu.vector_store %arg5[%c1, %c5_16, %c0_17], %26 {strides = array<i32>} : memref<2x16x32xf32, #tpu.memory_space<vmem>>, vector<1x4x32xf32>,
    return
  }
  func.func @transform_0(%arg0: i32, %arg1: memref<2xi32, #tpu.memory_space<smem>>) -> (i32, i32, i32) {
    %c0_i32 = arith.constant 0 : i32
    %c0_i32_0 = arith.constant 0 : i32
    %c0_i32_1 = arith.constant 0 : i32
    %c0_i32_2 = arith.constant 0 : i32
    return %c0_i32, %c0_i32_0, %c0_i32_1 : i32, i32, i32
  }
  func.func @transform_1(%arg0: i32, %arg1: memref<2xi32, #tpu.memory_space<smem>>) -> (i32, i32, i32) {
    %c0_i32 = arith.constant 0 : i32
    %c0_i32_0 = arith.constant 0 : i32
    %c0_i32_1 = arith.constant 0 : i32
    %c0_i32_2 = arith.constant 0 : i32
    return %c0_i32, %c0_i32_0, %c0_i32_1 : i32, i32, i32
  }
  func.func @transform_2(%arg0: i32, %arg1: memref<2xi32, #tpu.memory_space<smem>>) -> (i32, i32, i32) {
    %c0_i32 = arith.constant 0 : i32
    %c0_i32_0 = arith.constant 0 : i32
    %c0_i32_1 = arith.constant 0 : i32
    %c0_i32_2 = arith.constant 0 : i32
    return %c0_i32, %c0_i32_0, %c0_i32_1 : i32, i32, i32
  }
  func.func @transform_3(%arg0: i32, %arg1: memref<2xi32, #tpu.memory_space<smem>>) -> (i32, i32, i32) {
    %c0_i32 = arith.constant 0 : i32
    %c0_i32_0 = arith.constant 0 : i32
    %c0_i32_1 = arith.constant 0 : i32
    return %arg0, %c0_i32, %c0_i32_0 : i32, i32, i32
  }
}

</mosaic_0001>

<bundles_post_ra>
// kernel: tpu_custom_call.1
= control target key start
LH: loop header
LB: loop body
LE: loop exit
PB: predicated region body
PF: predicated region fallthrough
CT: control target
= control target key end

     0   :  { %s154_s0 = inlined_call_operand.vmem [shape: s32[2], index: 0, kind: input, shape index: {}]   ;;  %s155_s1 = inlined_call_operand.vmem [shape: f32[1,5,32], index: 1, kind: input, shape index: {}]   ;;  %s156_s2 = inlined_call_operand.vmem [shape: f32[1,7,32], index: 2, kind: input, shape index: {}]   ;;  %s157_s3 = inlined_call_operand.vmem [shape: f32[6,4,32], index: 3, kind: input, shape index: {}]   ;;  %s158_s4 = inlined_call_operand.hbm [shape: f32[2,16,32], index: 4, kind: output, shape index: {}]  }
   0x1   :  { %s9_s17 = sshll.u32 %s154_s0, 4  ;;  %s10_s17 = int_to_ptr.vmem [resolvable:$true] %s9_s17 }
   0x2   :  { %s71_s18 = scalar_lea.vmem %s10_s17, 16  ;;  %p76_p1 = scmp.lt.s32.totalorder %s10_s17, %s10_s17 }
   0x3   :  { %p72_p0 = scmp.ne.s32.totalorder %s10_s17, %s71_s18  ;;  %p77_p2 = scmp.lt.s32.totalorder %s71_s18, %s71_s18 }
   0x5   :  { %p78_p3 = por %p77_p2, %p76_p1 }
   0x7   :  { %p79_p4 = pnand %p78_p3, %p72_p0 }
   0x9   :  { %82 = shalt.err (!%p79_p4)  }
   0xa   :  { %s107_s19 = smov [#allocation3]  }
   0xb   :  { %12 = dma.vmem_to_smem %s10_s17, 16, %s107_s19, [#allocation2] }
   0xc   :  { %103 = dma.done.wait [#allocation2], 16 }
   0xd   :  { %104 = vsyncadd [#allocation2], 4294967280 }
   0xe   :  { %14 = sfence }
   0xf   :  { %v23_v0 = vld [vmem:[%s155_s1] sm:$0x1f]  ;;  %vm25_vm0 = vcmask 258048   ;;  %vm28_vm1 = vcmask 260096   ;;  %s31_s23 = sld [smem:[#allocation3]] }
  0x10   :  { %v24_v1 = vld [vmem:[%s156_s2] sm:$0x7f]  ;;  %26 = vst.msk [vmem:[#allocation4] sm:$0x1f] %vm25_vm0, %v23_v0  ;;  %27 = vst.msk [vmem:[#allocation4 + $0x10] sm:$0x1f] %vm25_vm0, %v23_v0 }
  0x11   :  { %29 = vst.msk [vmem:[#allocation4 + $0x9] sm:$0x7f] %vm28_vm1, %v24_v1  ;;  %30 = vst.msk [vmem:[#allocation4 + $0x19] sm:$0x7f] %vm28_vm1, %v24_v1 }
  0x12   :  { %15 = vsyncpa [#allocation5], 0  ;;  %s65_s24 = sld [smem:[#allocation3 + $0x1]]  ;;  %s108_s25 = smov [#allocation4]   ;;  %vm35_vm2 = vcmask 257024  }
  0x13   :  { %s49_s26 = sshll.u32 %s108_s25, 4  ;;  %s50_s26 = int_to_ptr.vmem [resolvable:$true] %s49_s26 }
  0x14   :  { %s83_s7 = scalar_lea.vmem %s50_s26, 512  ;;  %p88_p6 = scmp.lt.s32.totalorder %s50_s26, %s50_s26 }
  0x15   :  { %s64_s27 = sshll.u32 %s31_s23, 2  ;;  %p84_p5 = scmp.ne.s32.totalorder %s50_s26, %s83_s7 }
  0x16   :  { %s33_s29 = scalar_lea.vmem %s157_s3, %s64_s27  ;;  %p89_p7 = scmp.lt.s32.totalorder %s83_s7, %s83_s7 }
  0x17   :  { %v34_v2 = vld [vmem:[%s33_s29] sm:$0xf] }
  0x18   :  { %s66_s30 = sshll.u32 %s65_s24, 2  ;;  %36 = vst.msk [vmem:[#allocation4 + $0x5] sm:$0xf] %vm35_vm2, %v34_v2  ;;  %p90_p8 = por %p89_p7, %p88_p6 }
  0x19   :  { %s40_s6 = scalar_lea.vmem %s157_s3, %s66_s30 }
  0x1a   :  { %v41_v3 = vld [vmem:[%s40_s6] sm:$0xf]  ;;  %p91_p9 = pnand %p90_p8, %p84_p5 }
  0x1b   :  { %43 = vst.msk [vmem:[#allocation4 + $0x15] sm:$0xf] %vm35_vm2, %v41_v3 }
  0x1c   :  { %94 = shalt.err (!%p91_p9)
}
  0x1d   :  { %s109_s8 = smov 128   ;;  %s110_s9 = smov 8  }
  0x1e   :  { %55 = dma.vmem_to_hbm [thread:$0]  %s50_s26, 512, %s158_s4, [#allocation5], %s109_s8, %s109_s8, %s110_s9  }
  0x1f   :  { %105 = dma.done.wait [#allocation5], 512  }
  0x20   :  { %106 = vsyncadd [#allocation5], 4294966784 }
  0x21   :  { %59 = vsyncpa [#allocation5], 1 }

</bundles_post_ra>
